<compile_context>
chip_gen: v6e
topology: v6e:2x2x1
jax: 0.10.0
libtpu: 0.0.40
codegen_flags: <defaults>
</compile_context>

<pallas_src>
import functools

import jax
import jax.numpy as jnp
from jax.experimental import pallas as pl
from jax.experimental.pallas import tpu as pltpu


def _project3d_kernel(p_ref, pts_ref, out_ref, *, eps):
    # p_ref:   (B, 12) f32 in SMEM  -- pre-scaled projection matrices, row-major
    # pts_ref: (1, 4, st, C) f32    -- homogeneous points, (8,128)-friendly layout
    # out_ref: (1, 2, st, C) f32    -- normalized pixel coords (x-plane, y-plane)
    b = pl.program_id(0)

    x = pts_ref[0, 0]          # (st, C) -- full-occupancy vregs
    y = pts_ref[0, 1]
    z = pts_ref[0, 2]
    w = pts_ref[0, 3]

    def fma_row(r):
        # 4 scalar*vector FMAs on the VPU (scalars read from SMEM).
        return (p_ref[b, 4 * r + 0] * x
                + p_ref[b, 4 * r + 1] * y
                + p_ref[b, 4 * r + 2] * z
                + p_ref[b, 4 * r + 3] * w)

    cam_x = fma_row(0)                    # already scaled by 2/(W-1)
    cam_y = fma_row(1)                    # already scaled by 2/(H-1)
    cam_z = fma_row(2)                    # unscaled depth

    inv_z = pl.reciprocal(cam_z + eps, approx=False)
    out_ref[0, 0] = (cam_x * inv_z - 1.0).astype(out_ref.dtype)
    out_ref[0, 1] = (cam_y * inv_z - 1.0).astype(out_ref.dtype)


def _choose_tiles(n, vmem_block_budget=12 * 1024 * 1024):
    """Pick (R, C, st): the per-coordinate plane of N points is viewed as
    (R, C) with R*C == n, C a multiple of 128 when possible, and st a sublane
    tile (multiple of 8, or the full R) whose double-buffered blocks fit the
    VMEM budget."""
    C = None
    for c in (1024, 512, 256, 128):
        if n % c == 0:
            C = c
            break
    if C is None:
        # N not a multiple of 128: fall back to one lane-dense row per batch
        # (full-extent last dims are always legal).
        return 1, n, 1
    R = n // C
    # Bytes per grid step: (4 in planes + 2 out planes) * st * C * 4B, x2 buffers.
    max_elems = vmem_block_budget // 48          # st * C <= max_elems
    if R * C <= max_elems:
        return R, C, R                            # whole plane per batch element
    st = max((max_elems // C) // 8 * 8, 8)
    while st > 8 and R % st != 0:
        st -= 8
    if R % st != 0:
        st = R                                    # no clean divisor: whole plane
    return R, C, st


def project_3d(points, K, T, *, height, width, eps=1e-7):
    """points: (B, 4, H*W) f32, K: (B, 4, 4), T: (B, 4, 4)
    returns pix_coords: (B, H, W, 2) f32 (same semantics as the PyTorch module)."""
    B, four, N = points.shape
    assert four == 4 and N == height * width

    R, C, st = _choose_tiles(N)

    # Hoist K@T; fold the pixel normalization (2/(dim-1)) into rows 0/1 of P.
    P = jnp.matmul(K, T)[:, :3, :].astype(jnp.float32)                # (B, 3, 4)
    scale = jnp.array([2.0 / (width - 1), 2.0 / (height - 1), 1.0],
                      dtype=jnp.float32).reshape(1, 3, 1)
    P_scaled = (P * scale).reshape(B, 12)                             # (B, 12)

    # Contiguous, free reshape to an (8,128)-friendly layout.
    pts4 = points.astype(jnp.float32).reshape(B, 4, R, C)

    kernel = functools.partial(_project3d_kernel, eps=eps)

    out = pl.pallas_call(
        kernel,
        out_shape=jax.ShapeDtypeStruct((B, 2, R, C), jnp.float32),
        grid_spec=pltpu.PrefetchScalarGridSpec(
            num_scalar_prefetch=0,
            grid=(B, R // st),
            in_specs=[
                # whole (B, 12) matrix of scalars lives in SMEM
                pl.BlockSpec(memory_space=pltpu.MemorySpace.SMEM),
                # dense point tiles: sublane = st, lane = C
                pl.BlockSpec((1, 4, st, C), lambda b, j: (b, 0, j, 0)),
            ],
            out_specs=pl.BlockSpec((1, 2, st, C), lambda b, j: (b, 0, j, 0)),
        ),
        compiler_params=pltpu.CompilerParams(
            dimension_semantics=("parallel", "parallel"),
            vmem_limit_bytes=32 * 1024 * 1024),
    )(P_scaled, pts4)

    # Layout plumbing only, to match the PyTorch module's (B, H, W, 2) output.
    # TODO(synk): if the consumer accepts channel-major (B, 2, H, W), drop this
    # transpose to avoid an extra full-output HBM round trip (interleaving the
    # 2-wide channel in-kernel would force lane-sparse / strided stores).
    return out.reshape(B, 2, height, width).transpose(0, 2, 3, 1)


def _project_3d_ref(points, K, T, *, height, width, eps=1e-7):
    """Plain-JAX reference mirroring the PyTorch forward exactly."""
    B = points.shape[0]
    P = jnp.matmul(K, T)[:, :3, :]
    cam = jnp.matmul(P, points)                         # (B, 3, N)
    pix = cam[:, :2, :] / (cam[:, 2, :][:, None, :] + eps)
    pix = pix.reshape(B, 2, height, width).transpose(0, 2, 3, 1)
    pix = pix.at[..., 0].divide(width - 1)
    pix = pix.at[..., 1].divide(height - 1)
    return (pix - 0.5) * 2


if __name__ == "__main__":
    B, H, W = 2, 16, 16
    N = H * W
    key = jax.random.PRNGKey(0)
    k_pts, k_k, k_t = jax.random.split(key, 3)

    # Homogeneous 3D points (last row = 1), z kept positive to avoid / ~0.
    xyz = jax.random.normal(k_pts, (B, 3, N), dtype=jnp.float32)
    xyz = xyz.at[:, 2, :].set(jnp.abs(xyz[:, 2, :]) + 1.0)
    points = jnp.concatenate([xyz, jnp.ones((B, 1, N), jnp.float32)], axis=1)

    # Simple pinhole intrinsics (4x4) with small deterministic perturbation.
    base_K = jnp.array([[0.58 * W, 0.0, 0.5 * W, 0.0],
                        [0.0, 1.92 * H, 0.5 * H, 0.0],
                        [0.0, 0.0, 1.0, 0.0],
                        [0.0, 0.0, 0.0, 1.0]], dtype=jnp.float32)
    K = base_K[None] + 0.01 * jax.random.normal(k_k, (B, 4, 4), dtype=jnp.float32)

    # Camera pose: identity + small translation/perturbation.
    T = jnp.eye(4, dtype=jnp.float32)[None] + \
        0.05 * jax.random.normal(k_t, (B, 4, 4), dtype=jnp.float32)

    out = project_3d(points, K, T, height=H, width=W)
    out = jax.block_until_ready(out)

    ref = _project_3d_ref(points, K, T, height=H, width=W)
    assert out.shape == (B, H, W, 2)
    assert jnp.allclose(out, ref, rtol=1e-4, atol=1e-4), "mismatch vs reference"

    print("KERNEL_OK")
</pallas_src>

<mosaic_0001>
module attributes {stable_mosaic.version = 11 : i64} {
  func.func @_project3d_kernel(%arg0: i32, %arg1: i32, %arg2: memref<2x12xf32, #tpu.memory_space<smem>>, %arg3: memref<1x4x1x256xf32, #tpu.memory_space<vmem>>, %arg4: memref<1x2x1x256xf32, #tpu.memory_space<vmem>>) attributes {dimension_semantics = [#tpu.dimension_semantics<parallel>, #tpu.dimension_semantics<parallel>], iteration_bounds = array<i64: 2, 1>, scalar_prefetch = 0 : i64, scratch_operands = 0 : i64, tpu.core_type = #tpu.core_type<tc>, window_params = [{transform_indices = @transform_0, window_bounds = array<i64: 2, 12>}, {transform_indices = @transform_1, window_bounds = array<i64: 1, 4, 1, 256>}, {transform_indices = @transform_2, window_bounds = array<i64: 1, 2, 1, 256>}]} {
    %c0 = arith.constant 0 : index
    %c0_0 = arith.constant 0 : index
    %c0_1 = arith.constant 0 : index
    %c0_2 = arith.constant 0 : index
    %0 = vector.load %arg3[%c0, %c0_0, %c0_1, %c0_2] : memref<1x4x1x256xf32, #tpu.memory_space<vmem>>, vector<1x1x1x256xf32>
    %1 = vector.shape_cast %0 : vector<1x1x1x256xf32> to vector<1x256xf32>
    %c0_3 = arith.constant 0 : index
    %c1 = arith.constant 1 : index
    %c0_4 = arith.constant 0 : index
    %c0_5 = arith.constant 0 : index
    %2 = vector.load %arg3[%c0_3, %c1, %c0_4, %c0_5] : memref<1x4x1x256xf32, #tpu.memory_space<vmem>>, vector<1x1x1x256xf32>
    %3 = vector.shape_cast %2 : vector<1x1x1x256xf32> to vector<1x256xf32>
    %c0_6 = arith.constant 0 : index
    %c2 = arith.constant 2 : index
    %c0_7 = arith.constant 0 : index
    %c0_8 = arith.constant 0 : index
    %4 = vector.load %arg3[%c0_6, %c2, %c0_7, %c0_8] : memref<1x4x1x256xf32, #tpu.memory_space<vmem>>, vector<1x1x1x256xf32>
    %5 = vector.shape_cast %4 : vector<1x1x1x256xf32> to vector<1x256xf32>
    %c0_9 = arith.constant 0 : index
    %c3 = arith.constant 3 : index
    %c0_10 = arith.constant 0 : index
    %c0_11 = arith.constant 0 : index
    %6 = vector.load %arg3[%c0_9, %c3, %c0_10, %c0_11] : memref<1x4x1x256xf32, #tpu.memory_space<vmem>>, vector<1x1x1x256xf32>
    %7 = vector.shape_cast %6 : vector<1x1x1x256xf32> to vector<1x256xf32>
    %8 = arith.index_cast %arg0 : i32 to index
    %c0_12 = arith.constant 0 : index
    %9 = memref.load %arg2[%8, %c0_12] : memref<2x12xf32, #tpu.memory_space<smem>>
    %10 = vector.broadcast %9 : f32 to vector<1x256xf32>
    %11 = arith.mulf %10, %1 : vector<1x256xf32>
    %12 = arith.index_cast %arg0 : i32 to index
    %c1_13 = arith.constant 1 : index
    %13 = memref.load %arg2[%12, %c1_13] : memref<2x12xf32, #tpu.memory_space<smem>>
    %14 = vector.broadcast %13 : f32 to vector<1x256xf32>
    %15 = arith.mulf %14, %3 : vector<1x256xf32>
    %16 = arith.addf %11, %15 : vector<1x256xf32>
    %17 = arith.index_cast %arg0 : i32 to index
    %c2_14 = arith.constant 2 : index
    %18 = memref.load %arg2[%17, %c2_14] : memref<2x12xf32, #tpu.memory_space<smem>>
    %19 = vector.broadcast %18 : f32 to vector<1x256xf32>
    %20 = arith.mulf %19, %5 : vector<1x256xf32>
    %21 = arith.addf %16, %20 : vector<1x256xf32>
    %22 = arith.index_cast %arg0 : i32 to index
    %c3_15 = arith.constant 3 : index
    %23 = memref.load %arg2[%22, %c3_15] : memref<2x12xf32, #tpu.memory_space<smem>>
    %24 = vector.broadcast %23 : f32 to vector<1x256xf32>
    %25 = arith.mulf %24, %7 : vector<1x256xf32>
    %26 = arith.addf %21, %25 : vector<1x256xf32>
    %27 = arith.index_cast %arg0 : i32 to index
    %c4 = arith.constant 4 : index
    %28 = memref.load %arg2[%27, %c4] : memref<2x12xf32, #tpu.memory_space<smem>>
    %29 = vector.broadcast %28 : f32 to vector<1x256xf32>
    %30 = arith.mulf %29, %1 : vector<1x256xf32>
    %31 = arith.index_cast %arg0 : i32 to index
    %c5 = arith.constant 5 : index
    %32 = memref.load %arg2[%31, %c5] : memref<2x12xf32, #tpu.memory_space<smem>>
    %33 = vector.broadcast %32 : f32 to vector<1x256xf32>
    %34 = arith.mulf %33, %3 : vector<1x256xf32>
    %35 = arith.addf %30, %34 : vector<1x256xf32>
    %36 = arith.index_cast %arg0 : i32 to index
    %c6 = arith.constant 6 : index
    %37 = memref.load %arg2[%36, %c6] : memref<2x12xf32, #tpu.memory_space<smem>>
    %38 = vector.broadcast %37 : f32 to vector<1x256xf32>
    %39 = arith.mulf %38, %5 : vector<1x256xf32>
    %40 = arith.addf %35, %39 : vector<1x256xf32>
    %41 = arith.index_cast %arg0 : i32 to index
    %c7 = arith.constant 7 : index
    %42 = memref.load %arg2[%41, %c7] : memref<2x12xf32, #tpu.memory_space<smem>>
    %43 = vector.broadcast %42 : f32 to vector<1x256xf32>
    %44 = arith.mulf %43, %7 : vector<1x256xf32>
    %45 = arith.addf %40, %44 : vector<1x256xf32>
    %46 = arith.index_cast %arg0 : i32 to index
    %c8 = arith.constant 8 : index
    %47 = memref.load %arg2[%46, %c8] : memref<2x12xf32, #tpu.memory_space<smem>>
    %48 = vector.broadcast %47 : f32 to vector<1x256xf32>
    %49 = arith.mulf %48, %1 : vector<1x256xf32>
    %50 = arith.index_cast %arg0 : i32 to index
    %c9 = arith.constant 9 : index
    %51 = memref.load %arg2[%50, %c9] : memref<2x12xf32, #tpu.memory_space<smem>>
    %52 = vector.broadcast %51 : f32 to vector<1x256xf32>
    %53 = arith.mulf %52, %3 : vector<1x256xf32>
    %54 = arith.addf %49, %53 : vector<1x256xf32>
    %55 = arith.index_cast %arg0 : i32 to index
    %c10 = arith.constant 10 : index
    %56 = memref.load %arg2[%55, %c10] : memref<2x12xf32, #tpu.memory_space<smem>>
    %57 = vector.broadcast %56 : f32 to vector<1x256xf32>
    %58 = arith.mulf %57, %5 : vector<1x256xf32>
    %59 = arith.addf %54, %58 : vector<1x256xf32>
    %60 = arith.index_cast %arg0 : i32 to index
    %c11 = arith.constant 11 : index
    %61 = memref.load %arg2[%60, %c11] : memref<2x12xf32, #tpu.memory_space<smem>>
    %62 = vector.broadcast %61 : f32 to vector<1x256xf32>
    %63 = arith.mulf %62, %7 : vector<1x256xf32>
    %64 = arith.addf %59, %63 : vector<1x256xf32>
    %cst = arith.constant 1.000000e-07 : f32
    %65 = vector.broadcast %cst : f32 to vector<1x256xf32>
    %66 = arith.addf %64, %65 : vector<1x256xf32>
    %67 = tpu.reciprocal %66 : vector<1x256xf32> -> vector<1x256xf32>
    %68 = arith.mulf %26, %67 : vector<1x256xf32>
    %cst_16 = arith.constant 1.000000e+00 : f32
    %69 = vector.broadcast %cst_16 : f32 to vector<1x256xf32>
    %70 = arith.subf %68, %69 : vector<1x256xf32>
    %c0_17 = arith.constant 0 : index
    %c0_18 = arith.constant 0 : index
    %c0_19 = arith.constant 0 : index
    %c0_20 = arith.constant 0 : index
    %71 = vector.load %arg4[%c0_17, %c0_18, %c0_19, %c0_20] : memref<1x2x1x256xf32, #tpu.memory_space<vmem>>, vector<1x1x1x256xf32>
    %72 = vector.shape_cast %71 : vector<1x1x1x256xf32> to vector<1x256xf32>
    %73 = vector.shape_cast %70 : vector<1x256xf32> to vector<1x1x1x256xf32>
    tpu.vector_store %arg4[%c0_17, %c0_18, %c0_19, %c0_20], %73 {strides = array<i32>} : memref<1x2x1x256xf32, #tpu.memory_space<vmem>>, vector<1x1x1x256xf32>,
    %74 = arith.mulf %45, %67 : vector<1x256xf32>
    %cst_21 = arith.constant 1.000000e+00 : f32
    %75 = vector.broadcast %cst_21 : f32 to vector<1x256xf32>
    %76 = arith.subf %74, %75 : vector<1x256xf32>
    %c0_22 = arith.constant 0 : index
    %c1_23 = arith.constant 1 : index
    %c0_24 = arith.constant 0 : index
    %c0_25 = arith.constant 0 : index
    %77 = vector.load %arg4[%c0_22, %c1_23, %c0_24, %c0_25] : memref<1x2x1x256xf32, #tpu.memory_space<vmem>>, vector<1x1x1x256xf32>
    %78 = vector.shape_cast %77 : vector<1x1x1x256xf32> to vector<1x256xf32>
    %79 = vector.shape_cast %76 : vector<1x256xf32> to vector<1x1x1x256xf32>
    tpu.vector_store %arg4[%c0_22, %c1_23, %c0_24, %c0_25], %79 {strides = array<i32>} : memref<1x2x1x256xf32, #tpu.memory_space<vmem>>, vector<1x1x1x256xf32>,
    return
  }
  func.func @transform_0(%arg0: i32, %arg1: i32) -> (i32, i32) {
    %c0_i32 = arith.constant 0 : i32
    %c0_i32_0 = arith.constant 0 : i32
    %c0_i32_1 = arith.constant 0 : i32
    return %c0_i32, %c0_i32_0 : i32, i32
  }
  func.func @transform_1(%arg0: i32, %arg1: i32) -> (i32, i32, i32, i32) {
    %c0_i32 = arith.constant 0 : i32
    %c0_i32_0 = arith.constant 0 : i32
    %c0_i32_1 = arith.constant 0 : i32
    return %arg0, %c0_i32, %arg1, %c0_i32_0 : i32, i32, i32, i32
  }
  func.func @transform_2(%arg0: i32, %arg1: i32) -> (i32, i32, i32, i32) {
    %c0_i32 = arith.constant 0 : i32
    %c0_i32_0 = arith.constant 0 : i32
    %c0_i32_1 = arith.constant 0 : i32
    return %arg0, %c0_i32, %arg1, %c0_i32_0 : i32, i32, i32, i32
  }
}

</mosaic_0001>

<bundles_post_ra>
// kernel: tpu_custom_call.1
= control target key start
LH: loop header
LB: loop body
LE: loop exit
PB: predicated region body
PF: predicated region fallthrough
CT: control target
= control target key end

     0   :  { %s821_s0 = inlined_call_operand.hbm [shape: f32[2,12], index: 0, kind: input, shape index: {}]   ;;  %s822_s1 = inlined_call_operand.hbm [shape: f32[2,4,1,256], index: 1, kind: input, shape index: {}]   ;;  %s823_s2 = inlined_call_operand.hbm [shape: f32[2,2,1,256], index: 2, kind: output, shape index: {}]  }
   0x1   :  { %824 = sst [smem:[#allocation11_spill]] %s821_s0 }
   0x2   :  { %7 = vsyncpa [#allocation5], 0 }
   0x3   :  { %8 = vsyncpa [#allocation3], 0 }
   0x4   :  { %10 = vsyncpa [#allocation3 + $0x1], 0 }
   0x5   :  { %11 = vsyncpa [#allocation4], 0 }
   0x6   :  { %13 = vsyncpa [#allocation4 + $0x1], 0  ;;  %s636_s9 = smov 0   ;;  %s638_s10 = smov 0  }
   0x7   :  { %s640_s11 = smov 0   ;;  %s642_s12 = smov 0  }
   0x8   :  { %s644_s13 = smov 0   ;;  %s646_s14 = smov 0  }
   0x9 LB: > { %s384_s15 = sadd.s32 4294967295, %s612_s14   ;;  %s385_s16 = sadd.s32 4294967294, %s612_s14   ;;  %s612_s14 = sphi %s646_s14, %s19_s14   ;;  %s608_s13 = sphi %s644_s13, %s838_s13   ;;  %s604_s12 = sphi %s642_s12, %s837_s12   ;;  %s600_s11 = sphi %s640_s11, %s836_s11   ;;  %s596_s10 = sphi %s638_s10, %s835_s10   ;;  %s592_s9 = sphi %s636_s9, %s834_s9  }
   0xa   : > { %s61_s17 = sadd.s32 1, %s600_s11  ;;  %p68_p0 = scmp.ne.s32.totalorder %s600_s11, %s596_s10 }
   0xb   : > { %p69_p1 = scmp.eq.s32.totalorder %s612_s14, 0  ;;  %p74_p2 = scmp.ne.s32.totalorder %s596_s10, %s592_s9 }
   0xc   : > { %p674_p3 = scmp.eq.s32.totalorder %s384_s15, 0  ;;  %p100_p4 = scmp.eq.s32.totalorder %s384_s15, 1 }
   0xd   : > { %p70_p5 = por %p69_p1, %p68_p0  ;;  %p106_p6 = scmp.eq.s32.totalorder %s385_s16, 1 }
   0xe   : > { %p680_p7 = por %p674_p3, %p74_p2  ;;  %p684_p8 = por %p100_p4, %p68_p0 }
   0xf   : > { %p688_p9 = por %p106_p6, %p74_p2  ;;  %p386_p10 = scmp.ge.s32.totalorder %s612_s14, 1 }
  0x10   : > { %p113_p11 = scmp.lt.s32.totalorder %s612_s14, 3  ;;  %p431_p1 = scmp.lt.s32.totalorder %s612_s14, 2 }
  0x11   : > { %s828_s21 = scalar_select %p688_p9, 1, 0 }
  0x12   : > { %p695_p13 = pnand %p386_p10, %p113_p11  ;;  %s135_s23 = sand.u32 1, %s600_s11  }
  0x13   : > { %p703_p2 = pnand %p431_p1, %p70_p5  ;;  %s31_s25 = sadd.s32 1, %s608_s13 }
  0x14   : > { %p418_p0 = pneg %p695_p13  ;;  %s389_s26 = sshll.u32 %s135_s23, 3 }
  0x15   : > { %p33_p6 = scmp.ge.s32.totalorder %s31_s25, 2  ;;  %s614_s27 = smov [#allocation2]  }
  0x16   : > { %p419_p4 = pnand %p418_p0, %p674_p3  ;;  %s831_s0 = sld [smem:[#allocation11_spill]] }
  0x17   : > { %s840_s25 = smov (%p33_p6, %s31_s25), 0  ;;  %s408_s30 = sshll.u32 %s608_s13, 7 }
  0x18   : > { %s56_s3 = ssub.s32 %s608_s13, %s840_s25  ;;  %s147_s6 = scalar_lea.hbm %s822_s1, %s408_s30 }
  0x19   : > { %p59_p5 = scmp.eq.s32.totalorder %s56_s3, 0  ;;  %s139_s7 = scalar_lea.vmem [#allocation6], %s389_s26 }
  0x1a   : > { %s148_s8 = sshll.u32 %s139_s7, 4  ;;  %s136_s16 = scalar_lea.sflag [#allocation3], %s135_s23  ;;  %s149_s8 = int_to_ptr.vmem [resolvable:$true] %s148_s8 }
  0x1b   : > { %s724_s15 = scalar_select %p59_p5, %s600_s11, %s61_s17  }
  0x1c   : > { %421 = dma.hbm_to_smem (!%p419_p4), %s831_s0, 32, %s614_s27, [#allocation5]  }
  0x1d   : > { %p502_p10 = pneg %p703_p2  ;;  %s513_s27 = scalar_lea.vmem %s149_s8, 128 }
  0x1e   : > { %p514_p11 = scmp.ne.s32.totalorder %s149_s8, %s513_s27  ;;  %s615_s28 = smov [#allocation6]  }
  0x1f   : > { %s518_s29 = sshll.u32 %s615_s28, 4  ;;  %s519_s29 = int_to_ptr.vmem [resolvable:$false] %s518_s29 }
  0x20   : > { %p516_p1 = pnand %p514_p11, %p502_p10  ;;  %s520_s0 = scalar_lea.vmem %s519_s29, 256 }
  0x21   : > { %p521_p4 = scmp.lt.s32.totalorder %s149_s8, %s519_s29  ;;  %p522_p6 = scmp.lt.s32.totalorder %s520_s0, %s513_s27 }
  0x22   : > { %p517_p0 = pneg %p516_p1 }
  0x23   : > { %p523_p12 = por %p522_p6, %p521_p4 }
  0x25   : > { %p524_p9 = pnand %p523_p12, %p517_p0 }
  0x27   : > { %527 = shalt.err (!%p524_p9)
}
  0x28   : > { %s616_s26 = smov 32   ;;  %s617_s17 = smov 2  }
  0x29   : > { %425 = dma.hbm_to_vmem [thread:$0]  (!%p703_p2), %s147_s6, 128, %s149_s8, %s136_s16, %s616_s26, %s616_s26, %s617_s17  }
  0x2a   : > { %160 = sbr.rel (%p695_p13) target bundleno = 107 (0x6b), region = 28 }
  0x2f   : > { %579 = dma.done.wait (%p674_p3), [#allocation5], 32  }
  0x30   : > { %581 = vsyncadd (%p674_p3), [#allocation5], 4294967264  ;;  %s737_s0 = sand.u32 1, %s596_s10  }
  0x31   : > { %s394_s23 = sshll.u32 %s737_s0, 3  ;;  %s167_s30 = scalar_lea.sflag [#allocation3], %s737_s0 }
  0x32   : > { %s170_s3 = scalar_lea.vmem [#allocation6], %s394_s23 }
  0x33   : > { %583 = dma.done.wait (%p680_p7), %s167_s30, 128  }
  0x34   : > { %585 = vsyncadd (%p680_p7), %s167_s30, 4294967168 }
  0x35   : > { %175 = sfence }
  0x36   : > { %s746_s22 = sshll.u32 %s604_s12, 7  ;;  %v192_v0 = vld [vmem:[%s170_s3] sm:$0x3]  ;;  %v396_v1 = vld [vmem:[%s170_s3 + $0x2] sm:$0x3]  ;;  %v260_v38 = vlaneseq }
  0x37   : > { %s203_s18 = sadd.s32 1, %s746_s22  ;;  %s750_s24 = sld [smem:[#allocation2 + %s746_s22]]  ;;  %v397_v2 = vld [vmem:[%s170_s3 + $0x4] sm:$0x3]  ;;  %v398_v4 = vld [vmem:[%s170_s3 + $0x6] sm:$0x3] }
  0x38   : > { %s237_s4 = sadd.s32 8, %s746_s22  ;;  %s753_s5 = sld [smem:[#allocation2 + %s203_s18]]  ;;  %vm262_vm0 = vcmp.lt.s32.totalorder %v260_v38, 256 }
  0x39   : > { %s241_s19 = sadd.s32 9, %s746_s22  ;;  %s238_s6 = sld [smem:[#allocation2 + %s237_s4]] }
  0x3a   : > { %s246_s7 = sadd.s32 10, %s746_s22  ;;  %s242_s8 = sld [smem:[#allocation2 + %s241_s19]] }
  0x3b   : > { %s251_s16 = sadd.s32 11, %s746_s22  ;;  %s247_s27 = sld [smem:[#allocation2 + %s246_s7]] }
  0x3c   : > { %s252_s28 = sld [smem:[#allocation2 + %s251_s16]]  ;;  %s218_s29 = sadd.s32 4, %s746_s22 }
  0x3d   : > { %s222_s26 = sadd.s32 5, %s746_s22  ;;  %s208_s17 = sadd.s32 2, %s746_s22  ;;  %v201_v13 = vstv %s750_s24 }
  0x3e   : > { %s219_s23 = sld [smem:[#allocation2 + %s218_s29]]  ;;  %s227_s18 = sadd.s32 6, %s746_s22  ;;  %v205_v15 = vstv %s753_s5  ;;  %v202_v19 = vmul.f32 %v201_v13, %v192_v0 }
  0x3f   : > { %v239_v3 = vstv %s238_s6  ;;  %s223_s30 = sld [smem:[#allocation2 + %s222_s26]]  ;;  %s213_s19 = sadd.s32 3, %s746_s22  ;;  %v206_v20 = vmul.f32 %v396_v1, %v205_v15 }
  0x40   : > { %v240_v5 = vmul.f32 %v239_v3, %v192_v0  ;;  %v243_v6 = vstv %s242_s8  ;;  %s209_s4 = sld [smem:[#allocation2 + %s208_s17]]  ;;  %s232_s16 = sadd.s32 7, %s746_s22 }
  0x41   : > { %v244_v7 = vmul.f32 %v396_v1, %v243_v6  ;;  %v248_v8 = vstv %s247_s27  ;;  %s228_s7 = sld [smem:[#allocation2 + %s227_s18]]  ;;  %v207_v26 = vadd.f32 %v206_v20, %v202_v19  ;;  %s395_s22 = sshll.u32 %s737_s0, 2 }
  0x42   : > { %v249_v9 = vmul.f32 %v397_v2, %v248_v8  ;;  %v253_v10 = vstv %s252_s28  ;;  %s214_s29 = sld [smem:[#allocation2 + %s213_s19]]  ;;  %s191_s24 = scalar_lea.vmem [#allocation7], %s395_s22 }
  0x43   : > { %v245_v11 = vadd.f32 %v244_v7, %v240_v5  ;;  %v254_v12 = vmul.f32 %v398_v4, %v253_v10  ;;  %s233_s3 = sld [smem:[#allocation2 + %s232_s16]]  ;;  %s285_s5 = sshll.u32 %s191_s24, 4  ;;  %s768_s5 = int_to_ptr.vmem [resolvable:$true] %s285_s5 }
  0x44   : > { %v220_v16 = vstv %s219_s23  ;;  %s409_s6 = sshll.u32 %s604_s12, 6  ;;  %s270_s26 = scalar_lea.sflag [#allocation4], %s737_s0 }
  0x45   : > { %v250_v14 = vadd.f32 %v249_v9, %v245_v11  ;;  %v224_v17 = vstv %s223_s30  ;;  %v221_v22 = vmul.f32 %v220_v16, %v192_v0  ;;  %s773_s28 = scalar_lea.hbm %s823_s2, %s409_s6  ;;  %s528_s12 = scalar_lea.vmem %s768_s5, 64 }
  0x46   : > { %v225_v23 = vmul.f32 %v396_v1, %v224_v17  ;;  %v210_v24 = vstv %s209_s4  ;;  %p529_p3 = scmp.ne.s32.totalorder %s768_s5, %s528_s12  ;;  %s618_s17 = smov [#allocation7]  }
  0x47   : > { %v255_v18 = vadd.f32 %v254_v12, %v250_v14  ;;  %v229_v25 = vstv %s228_s7  ;;  %v211_v27 = vmul.f32 %v397_v2, %v210_v24  ;;  %s532_s23 = sshll.u32 %s618_s17, 4  ;;  %s533_s23 = int_to_ptr.vmem [resolvable:$false] %s532_s23 }
  0x48   : > { %v226_v28 = vadd.f32 %v225_v23, %v221_v22  ;;  %v230_v29 = vmul.f32 %v397_v2, %v229_v25  ;;  %v215_v30 = vstv %s214_s29  ;;  %p530_p7 = pnand %p529_p3, %p684_p8  ;;  %s534_s30 = scalar_lea.vmem %s533_s23, 128 }
  0x49   : > { %v256_v21 = vadd.f32 1e-07, %v255_v18  ;;  %v234_v31 = vstv %s233_s3  ;;  %v212_v32 = vadd.f32 %v211_v27, %v207_v26  ;;  %v216_v33 = vmul.f32 %v398_v4, %v215_v30  ;;  %p535_p12 = scmp.lt.s32.totalorder %s768_s5, %s533_s23  ;;  %p536_p13 = scmp.lt.s32.totalorder %s534_s30, %s528_s12 }
  0x4a   : > { %v231_v34 = vadd.f32 %v230_v29, %v226_v28  ;;  %v235_v35 = vmul.f32 %v398_v4, %v234_v31  ;;  %p531_p9 = pneg %p530_p7 }
  0x4b   : > { %487 = vrcp.f32 %v256_v21  ;;  %v217_v36 = vadd.f32 %v216_v33, %v212_v32  ;;  %p537_p2 = por %p536_p13, %p535_p12 }
  0x4c   : > { %v236_v37 = vadd.f32 %v235_v35, %v231_v34 }
  0x4d   : > { %p538_p5 = pnand %p537_p2, %p531_p9 }
  0x58   : > { %v488_v39 = vpop.eup %487 }
  0x59   : > { %v258_v40 = vmul.f32 %v488_v39, %v217_v36  ;;  %v265_v41 = vmul.f32 %v488_v39, %v236_v37 }
  0x5b   : > { %v400_v42 = vadd.f32 -1.0, %v258_v40  ;;  %v401_v43 = vadd.f32 -1.0, %v265_v41 }
  0x5d   : > { %264 = vst.msk [vmem:[%s191_s24] sm:$0x3] %vm262_vm0, %v400_v42  ;;  %402 = vst.msk [vmem:[%s191_s24 + $0x2] sm:$0x3] %vm262_vm0, %v401_v43 }
  0x5e   : > { %541 = shalt.err (!%p538_p5)
}
  0x5f   : > { %s542_s18 = scalar_lea.hbm %s773_s28, 64  ;;  %s546_s7 = scalar_lea.hbm %s823_s2, 128 }
  0x60   : > { %p543_p10 = scmp.ne.s32.totalorder %s773_s28, %s542_s18  ;;  %p547_p0 = scmp.lt.s32.totalorder %s773_s28, %s823_s2 }
  0x61   : > { %p548_p4 = scmp.lt.s32.totalorder %s546_s7, %s542_s18 }
  0x62   : > { %p544_p11 = pnand %p543_p10, %p684_p8 }
  0x63   : > { %p549_p6 = por %p548_p4, %p547_p0 }
  0x64   : > { %p545_p1 = pneg %p544_p11 }
  0x66   : > { %p550_p3 = pnand %p549_p6, %p545_p1 }
  0x68   : > { %553 = shalt.err (!%p550_p3)
}
  0x69   : > { %s619_s3 = smov 32   ;;  %s620_s22 = smov 2  }
  0x6a   : > { %416 = dma.vmem_to_hbm [thread:$0]  (%p684_p8), %s768_s5, 64, %s773_s28, %s270_s26, %s619_s3, %s619_s3, %s620_s22  }
  0x6b PF: > { %s300_s24 = sand.u32 1, %s592_s9   ;;  %p832_p7 = scmp.ne.s32.totalorder %s828_s21, 0 }
  0x6c   : > { %p833_p9 = scmp.ge.s32.totalorder %s612_s14, 2  ;;  %s301_s6 = scalar_lea.sflag [#allocation4], %s300_s24 }
  0x6e   : > { %p427_p12 = pnand %p833_p9, %p832_p7 }
  0x70   : > { %p428_p13 = pneg %p427_p12 }
  0x72   : > { %587 = dma.done.wait (%p428_p13), %s301_s6, 64  }
  0x73   : > { %589 = vsyncadd (%p428_p13), %s301_s6, 4294967232  ;;  %s19_s14 = sadd.s32 1, %s612_s14   ;;  %s834_s9 = smov %s596_s10 }
  0x74   : > { %p16_p2 = scmp.ge.s32.totalorder %s19_s14, 4   ;;  %s835_s10 = smov %s600_s11 }
  0x75   : > { %s836_s11 = smov %s724_s15  ;;  %s837_s12 = smov %s608_s13 }
  0x76   : > { %s838_s13 = smov %s840_s25  ;;  %18 = sbr.rel (!%p16_p2) target bundleno = 9 (0x9), region = 82 }
  0x7b   :  { %306 = vsyncpa [#allocation3], 1 }
  0x7c   :  { %308 = vsyncpa [#allocation3 + $0x1], 1 }
  0x7d   :  { %309 = vsyncpa [#allocation4], 1 }
  0x7e   :  { %311 = vsyncpa [#allocation4 + $0x1], 1 }
  0x7f   :  { %312 = vsyncpa [#allocation5], 1 }
  0x80   :  { %314 = vsyncpa [#allocation5 + $0x1], 1 }

</bundles_post_ra>
